<compile_context>
chip_gen: v7x
topology: tpu7x:2x2x1
jax: 0.10.0
libtpu: 0.0.40
codegen_flags: <defaults>
</compile_context>

<pallas_src>
import functools

import jax
import jax.numpy as jnp
from jax.experimental import pallas as pl
from jax.experimental.pallas import tpu as pltpu


# Actual double-buffered footprint at the recommended tiles is ~5-10 MiB;
# 32 MiB leaves compiler-scratch headroom on v7x (64 MiB physical) and is
# above v5e's 16 MiB default scoped limit.
_VMEM_LIMIT = 32 * 1024 * 1024


def _round_up(x, m):
    return ((x + m - 1) // m) * m


def _pick_m_tile(M, want):
    """Largest multiple of 8 <= min(want, M).  The grid uses pl.cdiv, so M
    need not be divisible by the tile (partial tail stores are masked).
    Falls back to the full extent only when M < 8 (full-extent block is legal)."""
    cap = min(want, M)
    t = (cap // 8) * 8
    return t if t >= 8 else M


def _pick_n_tile(V, want):
    """Lane-dense vocab tile: largest multiple of 128 <= min(want, roundup(V, 128));
    full extent when V < 128."""
    cap = min(want, _round_up(V, 128))
    t = (cap // 128) * 128
    return t if t >= 128 else V


# ----------------------------------------------------------------------------
# Fused kernel: encoder (dense + tanh + LayerNorm) computed once per token
# tile into VMEM scratch, then mask_lm logits for one vocab tile.
#   grid = (M tiles [parallel], V tiles [arbitrary, inner])
# ----------------------------------------------------------------------------
def bert_lm_kernel(emb_ref, wb_ref, bb_ref, g_ref, beta_ref,
                   wlm_ref, blm_ref, o_ref, h_ref):
    # Encoder body: runs once per token tile (j == 0); result stays resident
    # in VMEM scratch for the whole vocab sweep (vocab axis is 'arbitrary').
    @pl.when(pl.program_id(1) == 0)
    def _():
        h = jnp.tanh(
            jnp.dot(emb_ref[...], wb_ref[...],
                    preferred_element_type=jnp.float32)
            + bb_ref[...]
        )
        # One-pass LayerNorm: var = E[h^2] - mu^2, (h - mu) bound once.
        mu = jnp.mean(h, axis=-1, keepdims=True)
        ms = jnp.mean(h * h, axis=-1, keepdims=True)
        hn = (h - mu) * jax.lax.rsqrt(ms - mu * mu + 1e-5)
        h_ref[...] = (hn * g_ref[...] + beta_ref[...]).astype(h_ref.dtype)

    # mask_lm head for this (token tile, vocab tile).
    o_ref[...] = (
        jnp.dot(h_ref[...], wlm_ref[...], preferred_element_type=jnp.float32)
        + blm_ref[...]
    ).astype(o_ref.dtype)


def bert_lm_forward(x_ids, prep, *, tm=512, tn=512, logits_dtype=jnp.float32):
    """Full BertLM.forward: x = bert(x); out = mask_lm(x)."""
    B, S = x_ids.shape
    M = B * S
    H = prep["w_b"].shape[0]
    V = prep["w_lm"].shape[1]
    tm = _pick_m_tile(M, tm)
    tn = _pick_n_tile(V, tn)

    # Embedding lookup (gather) on the pre-cast bf16 table.
    # TODO(synk): stream embedding rows straight into VMEM with an in-kernel
    # DMA gather / scalar-prefetch row index map to skip this (M, H) HBM slab.
    emb = prep["emb_table"][x_ids.reshape(-1)]            # (M, H) bf16

    logits = pl.pallas_call(
        bert_lm_kernel,
        out_shape=jax.ShapeDtypeStruct((M, V), logits_dtype),
        grid_spec=pltpu.PrefetchScalarGridSpec(
            num_scalar_prefetch=0,
            grid=(pl.cdiv(M, tm), pl.cdiv(V, tn)),
            in_specs=[
                # emb tile: constant over j -> loaded once per token tile.
                pl.BlockSpec((tm, H), lambda i, j: (i, 0)),
                pl.BlockSpec((H, H), lambda i, j: (0, 0)),   # w_b
                pl.BlockSpec((1, H), lambda i, j: (0, 0)),   # b_b
                pl.BlockSpec((1, H), lambda i, j: (0, 0)),   # gamma
                pl.BlockSpec((1, H), lambda i, j: (0, 0)),   # beta
                pl.BlockSpec((H, tn), lambda i, j: (0, j)),  # w_lm vocab tile
                pl.BlockSpec((1, tn), lambda i, j: (0, j)),  # b_lm vocab tile
            ],
            out_specs=pl.BlockSpec((tm, tn), lambda i, j: (i, j)),
            scratch_shapes=[pltpu.VMEM((tm, H), jnp.bfloat16)],
        ),
        compiler_params=pltpu.CompilerParams(
            dimension_semantics=("parallel", "arbitrary"),
            vmem_limit_bytes=_VMEM_LIMIT,
        ),
    )(emb, prep["w_b"], prep["b_b"], prep["gamma"], prep["beta"],
      prep["w_lm"], prep["b_lm"])

    return logits.reshape(B, S, V)


# ----------------------------------------------------------------------------
# Parameters
# ----------------------------------------------------------------------------
def make_params(key, vocab_size, n_hidden):
    ks = jax.random.split(key, 6)
    lim_b = 1.0 / jnp.sqrt(n_hidden)
    return {
        "emb_table": jax.random.normal(ks[0], (vocab_size, n_hidden), jnp.float32) * 0.02,
        "w_b": jax.random.uniform(ks[1], (n_hidden, n_hidden), jnp.float32, -lim_b, lim_b),
        "b_b": jax.random.uniform(ks[2], (n_hidden,), jnp.float32, -lim_b, lim_b),
        "gamma": jnp.ones((n_hidden,), jnp.float32),
        "beta": jnp.zeros((n_hidden,), jnp.float32),
        # mask_lm = nn.Linear(n_hidden, vocab_size); stored as (H, V) = W^T
        "w_lm": jax.random.uniform(ks[3], (n_hidden, vocab_size), jnp.float32, -lim_b, lim_b),
        "b_lm": jax.random.uniform(ks[4], (vocab_size,), jnp.float32, -lim_b, lim_b),
    }


def prepare_params(params):
    """One-time dtype casts / reshapes hoisted out of the per-forward path."""
    H = params["w_b"].shape[0]
    V = params["w_lm"].shape[1]
    return {
        "emb_table": params["emb_table"].astype(jnp.bfloat16),
        "w_b": params["w_b"].astype(jnp.bfloat16),
        "b_b": params["b_b"].reshape(1, H).astype(jnp.float32),
        "gamma": params["gamma"].reshape(1, H).astype(jnp.float32),
        "beta": params["beta"].reshape(1, H).astype(jnp.float32),
        "w_lm": params["w_lm"].astype(jnp.bfloat16),
        "b_lm": params["b_lm"].reshape(1, V).astype(jnp.float32),
    }


def reference_forward(x_ids, params):
    B, S = x_ids.shape
    emb = params["emb_table"][x_ids.reshape(-1)]
    h = jnp.tanh(emb @ params["w_b"] + params["b_b"])
    mu = jnp.mean(h, axis=-1, keepdims=True)
    var = jnp.mean((h - mu) ** 2, axis=-1, keepdims=True)
    hn = (h - mu) * jax.lax.rsqrt(var + 1e-5) * params["gamma"] + params["beta"]
    out = hn @ params["w_lm"] + params["b_lm"]
    return out.reshape(B, S, -1)


if __name__ == "__main__":
    # Small shapes; V deliberately not a multiple of the vocab tile, and the
    # second config makes B*S not a multiple of the token tile, so both masked
    # tail-tile paths (token and vocab) are exercised.
    H, V = 32, 384   # n_hidden, vocab_size

    key = jax.random.PRNGKey(0)
    k_ids, k_params = jax.random.split(key)
    params = make_params(k_params, V, H)
    prep = prepare_params(params)   # one-time weight prep (hoisted)

    fwd = jax.jit(functools.partial(bert_lm_forward, tm=16, tn=256))

    for (B, S) in ((2, 16), (2, 13)):
        x_ids = jax.random.randint(jax.random.fold_in(k_ids, S), (B, S), 0, V,
                                   dtype=jnp.int32)
        out = jax.block_until_ready(fwd(x_ids, prep))
        ref = reference_forward(x_ids, params)
        assert out.shape == (B, S, V), out.shape
        # bf16 operands (incl. bf16 emb table) with f32 accumulation.
        assert jnp.allclose(out, ref, rtol=2e-2, atol=4e-2)
    print("KERNEL_OK")
</pallas_src>

<mosaic_0001>
module attributes {stable_mosaic.version = 11 : i64} {
  func.func @bert_lm_kernel(%arg0: i32, %arg1: i32, %arg2: memref<16x32xbf16, #tpu.memory_space<vmem>>, %arg3: memref<32x32xbf16, #tpu.memory_space<vmem>>, %arg4: memref<1x32xf32, #tpu.memory_space<vmem>>, %arg5: memref<1x32xf32, #tpu.memory_space<vmem>>, %arg6: memref<1x32xf32, #tpu.memory_space<vmem>>, %arg7: memref<32x256xbf16, #tpu.memory_space<vmem>>, %arg8: memref<1x256xf32, #tpu.memory_space<vmem>>, %arg9: memref<16x256xf32, #tpu.memory_space<vmem>>, %arg10: memref<16x32xbf16, #tpu.memory_space<vmem>>) attributes {dimension_semantics = [#tpu.dimension_semantics<parallel>, #tpu.dimension_semantics<arbitrary>], iteration_bounds = array<i64: 2, 2>, scalar_prefetch = 0 : i64, scratch_operands = 1 : i64, tpu.core_type = #tpu.core_type<tc>, window_params = [{transform_indices = @transform_0, window_bounds = array<i64: 16, 32>}, {pipeline_mode = #tpu.pipeline_mode<synchronous>, transform_indices = @transform_1, window_bounds = array<i64: 32, 32>}, {pipeline_mode = #tpu.pipeline_mode<synchronous>, transform_indices = @transform_2, window_bounds = array<i64: 1, 32>}, {pipeline_mode = #tpu.pipeline_mode<synchronous>, transform_indices = @transform_3, window_bounds = array<i64: 1, 32>}, {pipeline_mode = #tpu.pipeline_mode<synchronous>, transform_indices = @transform_4, window_bounds = array<i64: 1, 32>}, {transform_indices = @transform_5, window_bounds = array<i64: 32, 256>}, {transform_indices = @transform_6, window_bounds = array<i64: 1, 256>}, {transform_indices = @transform_7, window_bounds = array<i64: 16, 256>}]} {
    %c0_i32 = arith.constant 0 : i32
    %0 = arith.cmpi eq, %arg1, %c0_i32 : i32
    %1 = arith.extui %0 : i1 to i32
    %c0_i32_0 = arith.constant 0 : i32
    %2 = arith.cmpi ne, %1, %c0_i32_0 : i32
    scf.if %2 {
      %c0_8 = arith.constant 0 : index
      %c0_9 = arith.constant 0 : index
      %10 = vector.load %arg2[%c0_8, %c0_9] : memref<16x32xbf16, #tpu.memory_space<vmem>>, vector<16x32xbf16>
      %c0_10 = arith.constant 0 : index
      %c0_11 = arith.constant 0 : index
      %11 = vector.load %arg3[%c0_10, %c0_11] : memref<32x32xbf16, #tpu.memory_space<vmem>>, vector<32x32xbf16>
      %cst_12 = arith.constant dense<0.000000e+00> : vector<16x32xf32>
      %12 = tpu.matmul %10, %11, %cst_12 {dimension_numbers = #tpu.dot_dimension_numbers<[1], [0], [0], [1], [0, 0, 1, 1], [], []>} : vector<16x32xbf16>, vector<32x32xbf16>, vector<16x32xf32> -> vector<16x32xf32>
      %c0_13 = arith.constant 0 : index
      %c0_14 = arith.constant 0 : index
      %13 = vector.load %arg4[%c0_13, %c0_14] : memref<1x32xf32, #tpu.memory_space<vmem>>, vector<1x32xf32>
      %14 = vector.broadcast %13 : vector<1x32xf32> to vector<16x32xf32>
      %15 = arith.addf %12, %14 : vector<16x32xf32>
      %16 = math.tanh %15 : vector<16x32xf32>
      %cst_15 = arith.constant dense<0.000000e+00> : vector<16xf32>
      %17 = vector.multi_reduction <add>, %16, %cst_15 [1] : vector<16x32xf32> to vector<16xf32>
      %18 = vector.shape_cast %17 : vector<16xf32> to vector<16x1xf32>
      %cst_16 = arith.constant 3.200000e+01 : f32
      %19 = vector.broadcast %cst_16 : f32 to vector<16x1xf32>
      %20 = arith.divf %18, %19 : vector<16x1xf32>
      %21 = arith.mulf %16, %16 : vector<16x32xf32>
      %cst_17 = arith.constant dense<0.000000e+00> : vector<16xf32>
      %22 = vector.multi_reduction <add>, %21, %cst_17 [1] : vector<16x32xf32> to vector<16xf32>
      %23 = vector.shape_cast %22 : vector<16xf32> to vector<16x1xf32>
      %cst_18 = arith.constant 3.200000e+01 : f32
      %24 = vector.broadcast %cst_18 : f32 to vector<16x1xf32>
      %25 = arith.divf %23, %24 : vector<16x1xf32>
      %26 = vector.broadcast %20 : vector<16x1xf32> to vector<16x32xf32>
      %27 = arith.subf %16, %26 : vector<16x32xf32>
      %28 = arith.mulf %20, %20 : vector<16x1xf32>
      %29 = arith.subf %25, %28 : vector<16x1xf32>
      %cst_19 = arith.constant 9.99999974E-6 : f32
      %30 = vector.broadcast %cst_19 : f32 to vector<16x1xf32>
      %31 = arith.addf %29, %30 : vector<16x1xf32>
      %32 = math.rsqrt %31 : vector<16x1xf32>
      %33 = vector.broadcast %32 : vector<16x1xf32> to vector<16x32xf32>
      %34 = arith.mulf %27, %33 : vector<16x32xf32>
      %c0_20 = arith.constant 0 : index
      %c0_21 = arith.constant 0 : index
      %35 = vector.load %arg5[%c0_20, %c0_21] : memref<1x32xf32, #tpu.memory_space<vmem>>, vector<1x32xf32>
      %36 = vector.broadcast %35 : vector<1x32xf32> to vector<16x32xf32>
      %37 = arith.mulf %34, %36 : vector<16x32xf32>
      %c0_22 = arith.constant 0 : index
      %c0_23 = arith.constant 0 : index
      %38 = vector.load %arg6[%c0_22, %c0_23] : memref<1x32xf32, #tpu.memory_space<vmem>>, vector<1x32xf32>
      %39 = vector.broadcast %38 : vector<1x32xf32> to vector<16x32xf32>
      %40 = arith.addf %37, %39 : vector<16x32xf32>
      %41 = arith.truncf %40 : vector<16x32xf32> to vector<16x32xbf16>
      %c0_24 = arith.constant 0 : index
      %c0_25 = arith.constant 0 : index
      %42 = vector.load %arg10[%c0_24, %c0_25] : memref<16x32xbf16, #tpu.memory_space<vmem>>, vector<16x32xbf16>
      tpu.vector_store %arg10[%c0_24, %c0_25], %41 {strides = array<i32>} : memref<16x32xbf16, #tpu.memory_space<vmem>>, vector<16x32xbf16>,
    } else {
    }
    %c0 = arith.constant 0 : index
    %c0_1 = arith.constant 0 : index
    %3 = vector.load %arg10[%c0, %c0_1] : memref<16x32xbf16, #tpu.memory_space<vmem>>, vector<16x32xbf16>
    %c0_2 = arith.constant 0 : index
    %c0_3 = arith.constant 0 : index
    %4 = vector.load %arg7[%c0_2, %c0_3] : memref<32x256xbf16, #tpu.memory_space<vmem>>, vector<32x256xbf16>
    %cst = arith.constant dense<0.000000e+00> : vector<16x256xf32>
    %5 = tpu.matmul %3, %4, %cst {dimension_numbers = #tpu.dot_dimension_numbers<[1], [0], [0], [1], [0, 0, 1, 1], [], []>} : vector<16x32xbf16>, vector<32x256xbf16>, vector<16x256xf32> -> vector<16x256xf32>
    %c0_4 = arith.constant 0 : index
    %c0_5 = arith.constant 0 : index
    %6 = vector.load %arg8[%c0_4, %c0_5] : memref<1x256xf32, #tpu.memory_space<vmem>>, vector<1x256xf32>
    %7 = vector.broadcast %6 : vector<1x256xf32> to vector<16x256xf32>
    %8 = arith.addf %5, %7 : vector<16x256xf32>
    %c0_6 = arith.constant 0 : index
    %c0_7 = arith.constant 0 : index
    %9 = vector.load %arg9[%c0_6, %c0_7] : memref<16x256xf32, #tpu.memory_space<vmem>>, vector<16x256xf32>
    tpu.vector_store %arg9[%c0_6, %c0_7], %8 {strides = array<i32>} : memref<16x256xf32, #tpu.memory_space<vmem>>, vector<16x256xf32>,
    return
  }
  func.func @transform_0(%arg0: i32, %arg1: i32) -> (i32, i32) {
    %c0_i32 = arith.constant 0 : i32
    %c0_i32_0 = arith.constant 0 : i32
    return %arg0, %c0_i32 : i32, i32
  }
  func.func @transform_1(%arg0: i32, %arg1: i32) -> (i32, i32) {
    %c0_i32 = arith.constant 0 : i32
    %c0_i32_0 = arith.constant 0 : i32
    %c0_i32_1 = arith.constant 0 : i32
    return %c0_i32, %c0_i32_0 : i32, i32
  }
  func.func @transform_2(%arg0: i32, %arg1: i32) -> (i32, i32) {
    %c0_i32 = arith.constant 0 : i32
    %c0_i32_0 = arith.constant 0 : i32
    %c0_i32_1 = arith.constant 0 : i32
    return %c0_i32, %c0_i32_0 : i32, i32
  }
  func.func @transform_3(%arg0: i32, %arg1: i32) -> (i32, i32) {
    %c0_i32 = arith.constant 0 : i32
    %c0_i32_0 = arith.constant 0 : i32
    %c0_i32_1 = arith.constant 0 : i32
    return %c0_i32, %c0_i32_0 : i32, i32
  }
  func.func @transform_4(%arg0: i32, %arg1: i32) -> (i32, i32) {
    %c0_i32 = arith.constant 0 : i32
    %c0_i32_0 = arith.constant 0 : i32
    %c0_i32_1 = arith.constant 0 : i32
    return %c0_i32, %c0_i32_0 : i32, i32
  }
  func.func @transform_5(%arg0: i32, %arg1: i32) -> (i32, i32) {
    %c0_i32 = arith.constant 0 : i32
    %c0_i32_0 = arith.constant 0 : i32
    return %c0_i32, %arg1 : i32, i32
  }
  func.func @transform_6(%arg0: i32, %arg1: i32) -> (i32, i32) {
    %c0_i32 = arith.constant 0 : i32
    %c0_i32_0 = arith.constant 0 : i32
    return %c0_i32, %arg1 : i32, i32
  }
  func.func @transform_7(%arg0: i32, %arg1: i32) -> (i32, i32) {
    %c0_i32 = arith.constant 0 : i32
    return %arg0, %arg1 : i32, i32
  }
}

</mosaic_0001>

<bundles_post_ra>
// kernel: bert_lm_forward.1
= control target key start
LH: loop header
LB: loop body
LE: loop exit
PB: predicated region body
PF: predicated region fallthrough
CT: control target
= control target key end

     0   :  { %s2150_s0 = inlined_call_operand.vmem [shape: bf16[32,32], index: 0, kind: input, shape index: {}]   ;;  %s2151_s1 = inlined_call_operand.vmem [shape: bf16[32,32], index: 1, kind: input, shape index: {}]   ;;  %s2152_s2 = inlined_call_operand.vmem [shape: f32[1,32], index: 2, kind: input, shape index: {}]   ;;  %s2153_s3 = inlined_call_operand.vmem [shape: f32[1,32], index: 3, kind: input, shape index: {}]   ;;  %s2154_s4 = inlined_call_operand.vmem [shape: f32[1,32], index: 4, kind: input, shape index: {}]   ;;  %s2155_s5 = inlined_call_operand.vmem [shape: bf16[32,384], index: 5, kind: input, shape index: {}]   ;;  %s2156_s6 = inlined_call_operand.vmem [shape: f32[1,384], index: 6, kind: input, shape index: {}]   ;;  %s2157_s7 = inlined_call_operand.hbm [shape: f32[32,384], index: 7, kind: output, shape index: {}]  }
   0x1   :  { %2165 = sst [smem:[#allocation16_spill]] %s2155_s5 }
   0x2   :  { %12 = vsyncpa [#allocation5], 0 }
   0x3   :  { %14 = vsyncpa [#allocation5 + $0x1], 0  ;;  %s1801_s24 = smov 0   ;;  %s1803_s25 = smov 0  }
   0x4   :  { %s1805_s26 = smov 0   ;;  %s1807_s27 = smov 0  }
   0x5   :  { %s1809_s28 = smov 0   ;;  %s1811_s29 = smov 0  }
   0x6   :  { %s1813_s30 = smov 0   ;;  %s1815_s8 = smov 0  }
   0x7   :  { %s1817_s9 = smov 0   ;;  %s1819_s10 = smov 0  }
   0x8 LB: > { %2166 = sst [smem:[#allocation7_spill]] %s1691_s26  ;;  %s1226_s11 = sadd.s32 4294967295, %s1719_s10   ;;  %s1719_s10 = sphi %s1819_s10, %s20_s10   ;;  %s1715_s9 = sphi %s1817_s9, %s2193_s9   ;;  %s1711_s8 = sphi %s1815_s8, %s2192_s8   ;;  %s1707_s30 = sphi %s1813_s30, %s2191_s30   ;;  %s1703_s29 = sphi %s1811_s29, %s2190_s29   ;;  %s1699_s28 = sphi %s1809_s28, %s2189_s28   ;;  %s1695_s27 = sphi %s1807_s27, %s2188_s27   ;;  %s1691_s26 = sphi %s1805_s26, %s2187_s26   ;;  %s1687_s25 = sphi %s1803_s25, %s2195_s25   ;;  %s1683_s24 = sphi %s1801_s24, %s2194_s24  }
   0x9   : > { %2167 = sst [smem:[#allocation8_spill]] %s1699_s28  ;;  %s1227_s12 = sadd.s32 4294967294, %s1719_s10  }
   0xa   : > { %2168 = sst [smem:[#allocation9_spill]] %s1711_s8  ;;  %s29_s13 = sadd.s32 1, %s1711_s8 }
   0xb   : > { %2169 = sst [smem:[#allocation10_spill]] %s1715_s9  ;;  %s32_s14 = sadd.s32 1, %s1715_s9 }
   0xc   : > { %p30_p0 = scmp.ge.s32.totalorder %s29_s13, 2  ;;  %s149_s15 = sadd.s32 1, %s1699_s28 }
   0xd   : > { %p156_p1 = scmp.ne.s32.totalorder %s1699_s28, %s1695_s27  ;;  %p157_p2 = scmp.eq.s32.totalorder %s1719_s10, 0 }
   0xe   : > { %s2197_s13 = smov (%p30_p0, %s29_s13), 0  ;;  %s2199_s14 = smov (!%p30_p0, %s32_s14), %s1715_s9 }
   0xf   : > { %2170 = sst [smem:[#allocation11_spill]] %s2197_s13  ;;  %s146_s16 = ssub.s32 %s1711_s8, %s2197_s13 }
  0x10   : > { %p1864_p3 = por %p157_p2, %p156_p1  ;;  %p34_p4 = scmp.ge.s32.totalorder %s2199_s14, 2 }
  0x11   : > { %p147_p5 = scmp.eq.s32.totalorder %s146_s16, 0  ;;  %s203_s18 = sadd.s32 1, %s1691_s26 }
  0x12   : > { %p213_p6 = scmp.ne.s32.totalorder %s1691_s26, %s1687_s25  ;;  %s2201_s14 = smov (%p34_p4, %s2199_s14), 0 }
  0x13   : > { %2172 = sst [smem:[#allocation12_spill]] %s2201_s14  ;;  %s198_s20 = ssub.s32 %s1715_s9, %s2201_s14 }
  0x14   : > { %s1874_s19 = scalar_select %p147_p5, %s1699_s28, %s149_s15  }
  0x15   : > { %p214_p7 = scmp.eq.s32.totalorder %s1226_s11, 3  ;;  %s200_s21 = sor.u32 %s198_s20, %s146_s16 }
  0x16   : > { %2173 = sst [smem:[#allocation13_spill]] %s1874_s19  ;;  %p219_p8 = scmp.ne.s32.totalorder %s1687_s25, %s1683_s24 }
  0x17   : > { %p201_p9 = scmp.eq.s32.totalorder %s200_s21, 0  ;;  %p1880_p10 = por %p214_p7, %p213_p6 }
  0x18   : > { %p220_p11 = scmp.eq.s32.totalorder %s1227_s12, 3  ;;  %p1229_p13 = scmp.ge.s32.totalorder %s1719_s10, 4 }
  0x19   : > { %s1885_s23 = scalar_select %p201_p9, %s1691_s26, %s203_s18  }
  0x1a   : > { %p1887_p12 = por %p220_p11, %p219_p8  ;;  %248 = sbr.rel (%p1229_p13) target bundleno = 121 (0x79), region = 32 }
  0x1b   : > { %2175 = sst [smem:[#allocation14_spill]] %s1885_s23 }
  0x1c   : > { %s2176_s13 = scalar_select %p1887_p12, 1, 0 }
  0x1e   : > { %2177 = sst [smem:[#allocation15_spill]] %s2176_s13 }
  0x21   : > { %260 = sbr.rel (!%p1864_p3) target bundleno = 121 (0x79), region = 40  ;;  %s262_s11 = sand.u32 (%p1864_p3), 1, %s1699_s28  }
  0x22   : > { %s1231_s15 = sshll.u32 (%p1864_p3), %s1711_s8, 1  ;;  %s1230_s16 = sshll.u32 (%p1864_p3), %s262_s11, 5 }
  0x23   : > { %s266_s20 = ssub.s32 (%p1864_p3), 3, %s1231_s15  ;;  %s1288_s12 = sshll.u32 (%p1864_p3), %s1711_s8, 3 }
  0x24   : > { %p267_p0 = scmp.lt.s32.totalorder (%p1864_p3), %s266_s20, 2  ;;  %s2178_s5 = sld [smem:[#allocation16_spill]] (%p1864_p3) }
  0x25   : > { %s1904_s17 = scalar_lea.vmem (%p1864_p3), [#allocation3], %s1230_s16  }
  0x28   : > { %s2203_s20 = smov (!%p267_p0, %s266_s20), 2 }
  0x29   : > { %s1232_s9 = sshll.u32 %s2203_s20, 8  ;;  %s1902_s19 = sshll.u32 %s2203_s20, 2 }
  0x2a   : > { %s1900_s14 = scalar_lea.vmem %s2178_s5, %s1288_s12   ;;  %p1236_p1 = scmp.eq.s32.totalorder %s1232_s9, 0 }
  0x2b   : > { %p277_p2 = scmp.lt.u32.totalorder (!%p1236_p1), %s1902_s19, 8 }
  0x2c   : > { %276 = sbr.rel (%p1236_p1) target bundleno = 121 (0x79), region = 44 }
  0x33   : > { %280 = sbr.rel (%p277_p2) target bundleno = 112 (0x70), region = 48  ;;  %s1908_s11 = sand.u32 (!%p277_p2), 7, %s1902_s19  }
  0x34   : > { %p302_p3 = scmp.eq.s32.totalorder (!%p277_p2), %s1908_s11, 0  ;;  %p1237_p4 = scmp.ne.s32.totalorder (!%p277_p2), %s1908_s11, 0 }
  0x3a   : > { %305 = sbr.rel (%p1237_p4) target bundleno = 82 (0x52), region = 63  ;;  %s306_s15 = sshrl.u32 (!%p1237_p4), %s1902_s19, 3 }
  0x3b   : > { %s307_s20 = sshrl.u32 (!%p1237_p4), %s306_s15, 4  ;;  %s1913_s16 = sand.u32 (!%p1237_p4), 15, %s306_s15  }
  0x3c   : > { %s1289_s9 = sshll.u32 (!%p1237_p4), %s307_s20, 11  ;;  %p1244_p5 = scmp.le.s32.totalorder (!%p1237_p4), %s1913_s16, 0 }
  0x3d   : > { %s458_s12 = sshra.s32 (!%p1237_p4), %s1289_s9, 4 }
  0x3e   : > { %s1916_s18 = scalar_lea.vmem (!%p1237_p4), %s1900_s14, %s458_s12   ;;  %s1919_s21 = scalar_lea.vmem (!%p1237_p4), %s1904_s17, %s458_s12 [#allocation3]  }
  0x41   : > { %1145 = sbr.rel (%p1244_p5) target bundleno = 82 (0x52), region = 187  ;;  %s2179_s5 = smov (!%p1244_p5), %s1919_s21 }
  0x42   : > { %s2180_s8 = smov (!%p1244_p5), %s1916_s18  ;;  %s1928_s28 = smov (!%p1244_p5), 0  }
  0x43   : > { %s1733_s23 = smov (!%p1244_p5), 0  }
  0x48 LB: >> { %v474_v0 = vld [vmem:[%s1727_s8] sm:$0xff]  ;;  %v476_v1 = vld [vmem:[%s1727_s8 + $0xc] sm:$0xff]  ;;  %v478_v2 = vld [vmem:[%s1727_s8 + $0x18] sm:$0xff]  ;;  %s482_s15 = sadd.s32 1, %s1731_s28  ;;  %s468_s23 = sadd.s32 1, %s1735_s23   ;;  %s1735_s23 = sphi %s1733_s23, %s468_s23   ;;  %s1731_s28 = sphi %s1928_s28, %s2181_s28   ;;  %s1727_s8 = sphi %s2180_s8, %s487_s8   ;;  %s1723_s5 = sphi %s2179_s5, %s488_s5  }
  0x49   : >> { %475 = vst [vmem:[%s1723_s5] sm:$0xff] %v474_v0  ;;  %477 = vst [vmem:[%s1723_s5 + $0x8] sm:$0xff] %v476_v1  ;;  %v480_v3 = vld [vmem:[%s1727_s8 + $0x24] sm:$0xff]  ;;  %p483_p6 = scmp.ge.s32.totalorder %s482_s15, %s1913_s16  ;;  %p467_p7 = scmp.ge.s32.totalorder %s468_s23, %s1913_s16 }
  0x4a   : >> { %479 = vst [vmem:[%s1723_s5 + $0x10] sm:$0xff] %v478_v2  ;;  %481 = vst [vmem:[%s1723_s5 + $0x18] sm:$0xff] %v480_v3 }
  0x4b   : >> { %s2205_s15 = smov (%p483_p6, %s482_s15), 0  ;;  %470 = sbr.rel (!%p467_p7) target bundleno = 72 (0x48), region = 193 }
  0x4c   : >> { %s1245_s20 = sshll.u32 %s2205_s15, 3  ;;  %s2181_s28 = smov %s2205_s15 }
  0x4d   : >> { %s487_s8 = scalar_lea.vmem %s1916_s18, %s1245_s20   ;;  %s488_s5 = scalar_lea.vmem %s1919_s21, %s1245_s20 [#allocation3]  }
  0x52 PF: > { %491 = sbr.rel (%p302_p3) target bundleno = 112 (0x70), region = 81  ;;  %s493_s28 = ssub.s32 (!%p302_p3), %s1902_s19, %s1908_s11 }
  0x53   : > { %s497_s9 = sshrl.u32 (!%p302_p3), %s1902_s19, 3  ;;  %s1949_s12 = scalar_lea.vmem (!%p302_p3), %s1900_s14, %s493_s28 }
  0x54   : > { %s1952_s20 = scalar_lea.vmem (!%p302_p3), %s1904_s17, %s493_s28 [#allocation3]  ;;  %s498_s23 = sshrl.u32 (!%p302_p3), %s497_s9, 4 }
  0x55   : > { %s1954_s15 = sand.u32 (!%p302_p3), 15, %s497_s9   ;;  %s1291_s5 = sshll.u32 (!%p302_p3), %s498_s23, 11 }
  0x56   : > { %s649_s8 = sshra.s32 (!%p302_p3), %s1291_s5, 4  ;;  %p1253_p8 = scmp.le.s32.totalorder (!%p302_p3), %s1954_s15, 0 }
  0x57   : > { %s1957_s16 = scalar_lea.vmem (!%p302_p3), %s1900_s14, %s649_s8   ;;  %s1960_s18 = scalar_lea.vmem (!%p302_p3), %s1904_s17, %s649_s8 [#allocation3]  }
  0x59   : > { %1173 = sbr.rel (%p1253_p8) target bundleno = 106 (0x6a), region = 209  ;;  %s2182_s21 = smov (!%p1253_p8), %s1960_s18 }
  0x5a   : > { %s2183_s26 = smov (!%p1253_p8), %s1957_s16  ;;  %s1969_s28 = smov (!%p1253_p8), 0  }
  0x5b   : > { %s1749_s13 = smov (!%p1253_p8), 0  }
  0x60 LB: >> { %v665_v4 = vld [vmem:[%s1743_s26] sm:$0xff]  ;;  %v667_v5 = vld [vmem:[%s1743_s26 + $0xc] sm:$0xff]  ;;  %v669_v6 = vld [vmem:[%s1743_s26 + $0x18] sm:$0xff]  ;;  %s673_s9 = sadd.s32 1, %s1747_s28  ;;  %s659_s13 = sadd.s32 1, %s1751_s13   ;;  %s1751_s13 = sphi %s1749_s13, %s659_s13   ;;  %s1747_s28 = sphi %s1969_s28, %s2184_s28   ;;  %s1743_s26 = sphi %s2183_s26, %s678_s26   ;;  %s1739_s21 = sphi %s2182_s21, %s679_s21  }
  0x61   : >> { %666 = vst [vmem:[%s1739_s21] sm:$0xff] %v665_v4  ;;  %668 = vst [vmem:[%s1739_s21 + $0x8] sm:$0xff] %v667_v5  ;;  %v671_v7 = vld [vmem:[%s1743_s26 + $0x24] sm:$0xff]  ;;  %p674_p9 = scmp.ge.s32.totalorder %s673_s9, %s1954_s15  ;;  %p658_p11 = scmp.ge.s32.totalorder %s659_s13, %s1954_s15 }
  0x62   : >> { %670 = vst [vmem:[%s1739_s21 + $0x10] sm:$0xff] %v669_v6  ;;  %672 = vst [vmem:[%s1739_s21 + $0x18] sm:$0xff] %v671_v7 }
  0x63   : >> { %s2207_s9 = smov (%p674_p9, %s673_s9), 0  ;;  %661 = sbr.rel (!%p658_p11) target bundleno = 96 (0x60), region = 215 }
  0x64   : >> { %s1254_s23 = sshll.u32 %s2207_s9, 3  ;;  %s2184_s28 = smov %s2207_s9 }
  0x65   : >> { %s678_s26 = scalar_lea.vmem %s1957_s16, %s1254_s23   ;;  %s679_s21 = scalar_lea.vmem %s1960_s18, %s1254_s23 [#allocation3]  }
  0x6a PF: > { %s1753_s5 = smov 0  }
  0x6b   : > { %s680_s8 = sshllo.u32 %s1753_s5, %s1908_s11 }
  0x6c   : > { %v689_v8 = vld [vmem:[%s1949_s12] sm:%s680_s8]  ;;  %v691_v9 = vld [vmem:[%s1949_s12 + $0xc] sm:%s680_s8] }
  0x6d   : > { %690 = vst [vmem:[%s1952_s20] sm:%s680_s8] %v689_v8  ;;  %692 = vst [vmem:[%s1952_s20 + $0x8] sm:%s680_s8] %v691_v9 }
  0x6e   : > { %v693_v10 = vld [vmem:[%s1949_s12 + $0x18] sm:%s680_s8]  ;;  %v695_v11 = vld [vmem:[%s1949_s12 + $0x24] sm:%s680_s8] }
  0x6f   : > { %694 = vst [vmem:[%s1952_s20 + $0x10] sm:%s680_s8] %v693_v10  ;;  %696 = vst [vmem:[%s1952_s20 + $0x18] sm:%s680_s8] %v695_v11 }
  0x70 PF: > { %p1256_p13 = scmp.ge.u32.totalorder %s1902_s19, 8 }
  0x71   : > { %s1754_s26 = smov (!%p1256_p13), 0  }
  0x72   : > { %283 = sbr.rel (%p1256_p13) target bundleno = 121 (0x79), region = 52  ;;  %s284_s13 = sshllo.u32 (!%p1256_p13), %s1754_s26, %s1902_s19 }
  0x73   : > { %v293_v12 = vld [vmem:[%s1900_s14] sm:%s284_s13] (!%p1256_p13)  ;;  %v295_v13 = vld [vmem:[%s1900_s14 + $0xc] sm:%s284_s13] (!%p1256_p13) }
  0x74   : > { %294 = vst [vmem:[%s1904_s17] sm:%s284_s13] (!%p1256_p13), %v293_v12  ;;  %296 = vst [vmem:[%s1904_s17 + $0x8] sm:%s284_s13] (!%p1256_p13), %v295_v13 }
  0x75   : > { %v297_v14 = vld [vmem:[%s1900_s14 + $0x18] sm:%s284_s13] (!%p1256_p13)  ;;  %v299_v15 = vld [vmem:[%s1900_s14 + $0x24] sm:%s284_s13] (!%p1256_p13) }
  0x76   : > { %298 = vst [vmem:[%s1904_s17 + $0x10] sm:%s284_s13] (!%p1256_p13), %v297_v14  ;;  %300 = vst [vmem:[%s1904_s17 + $0x18] sm:%s284_s13] (!%p1256_p13), %v299_v15 }
  0x79 PF: > { %p1257_p0 = scmp.ge.s32.totalorder %s1719_s10, 1  ;;  %p715_p1 = scmp.lt.s32.totalorder %s1719_s10, 5 }
  0x7b   : > { %p716_p2 = pnand %p1257_p0, %p715_p1 }
  0x7c   : > { %s722_s19 = sand.u32 (!%p716_p2), 1, %s1695_s27   ;;  %s763_s11 = sand.u32 (!%p716_p2), 1, %s1687_s25  }
  0x7d   : > { %719 = sbr.rel (%p716_p2) target bundleno = 800 (0x320), region = 110  ;;  %s1258_s14 = sshll.u32 (!%p716_p2), %s722_s19, 5 }
  0x7e   : > { %s1259_s17 = sshll.u32 (!%p716_p2), %s763_s11, 5  ;;  %s1260_s12 = sshll.u32 (!%p716_p2), %s1707_s30, 1 }
  0x7f   : > { %s2011_s20 = sshll.u32 (!%p716_p2), %s1703_s29, 1  ;;  %p767_p3 = scmp.lt.s32.totalorder (!%p716_p2), %s1260_s12, 3 }
  0x80   : > { %p782_p4 = scmp.lt.s32.totalorder (!%p716_p2), %s2011_s20, 2  ;;  %s2024_s5 = scalar_lea.vmem (!%p716_p2), [#allocation3], %s1258_s14 }
  0x81   : > { %s2026_s8 = scalar_lea.vmem (!%p716_p2), [#allocation4], %s1259_s17  ;;  %p1263_p5 = scmp.ne.s32.totalorder (!%p716_p2), %s1703_s29, 0 }
  0x84   : > { %s2209_s12 = smov (!%p767_p3, %s1260_s12), 3  ;;  %800 = sbr.rel (%p1263_p5) target bundleno = 543 (0x21f), region = 118 }
  0x85   : > { %s2015_s15 = scalar_select %p782_p4, %s2011_s20, 2 }
  0x86   : > { %s1261_s16 = sshll.u32 %s2209_s12, 2  ;;  %v1528_v16 = vld [vmem:[%s2151_s1] sm:$0xff] (!%p1263_p5)   ;;  %v1755_v17 = vmov (!%p1263_p5), 0.0   ;;  %v1529_v18 = vld [vmem:[%s2151_s1 + $0x8] sm:$0xff] (!%p1263_p5)   ;;  %vm1756_vm0 = vmmov (!%p1263_p5), 0   ;;  %vm831_vm1 = vcmask (!%p1263_p5), 261120  }
  0x87   : > { %s770_s27 = scalar_lea.vmem %s2150_s0, %s1261_s16  ;;  %s784_s23 = scalar_lea.vmem %s2156_s6, %s2015_s15  ;;  %1298 = vmatprep.subr.bf16.mxu0 (!%p1263_p5), %v1755_v17  ;;  %1302 = vmatprep.mubr.msk.bf16.mxu0 (!%p1263_p5), %vm1756_vm0, %v1755_v17  ;;  %v1264_v20 = vld [vmem:[%s2152_s2] ss:$0 sm:$0xff] (!%p1263_p5) }
  0x88   : > { %1299 = vmatpush3.bf16.msra.mxu0 (!%p1263_p5), %v1528_v16  ;;  %v1530_v19 = vld [vmem:[%s770_s27] sm:$0xff] (!%p1263_p5)  }
  0x89   : > { %1300 = vmatprep.subr.bf16.mxu0 (!%p1263_p5), %v1755_v17  ;;  %v1269_v52 = vld [vmem:[%s2153_s3] ss:$0 sm:$0xff] (!%p1263_p5) }
  0x8a   : > { %v1270_v57 = vld [vmem:[%s2154_s4] ss:$0 sm:$0xff] (!%p1263_p5) }
  0x8c   : > { %1301 = vmatpush3.bf16.msra.mxu0 %v1529_v18 }
  0x8f   : > { %1303 = vmatmul.mubr.msk.bf16.vlgmr.msra.gmra.mrb[0].mxu0 %vm831_vm1, %v1530_v19 }
 0x162   : > { %v869_v21 = vpop.f32.mrb[0].mxu0 }
 0x163   : > { %v870_v22 = vadd.f32 %v1264_v20, %v869_v21  ;;  %v1304_v23 = vpop.f32.mrb[1].mxu0 }
 0x164   : > { %v872_v24 = vpop.f32.mrb[2].mxu0 }
 0x165   : > { %1531 = vtanh.f32 %v870_v22  ;;  %v873_v25 = vadd.f32 %v1264_v20, %v872_v24  ;;  %v1305_v26 = vpop.f32.mrb[3].mxu0 }
 0x167   : > { %1533 = vtanh.f32 %v873_v25 }
 0x16f   : > { %v1532_v27 = vpop.eup %1531 }
 0x170   : > { %v878_v28 = vsel %vm831_vm1, %v1532_v27, 0.0  ;;  %v887_v29 = vmul.f32 %v1532_v27, %v1532_v27 }
 0x171   : > { %v1534_v30 = vpop.eup %1533  ;;  %879 = vadd.xlane.f32.xlu0 %v878_v28 }
 0x172   : > { %v889_v31 = vsel %vm831_vm1, %v887_v29, 0.0  ;;  %v888_v32 = vmul.f32 %v1534_v30, %v1534_v30  ;;  %v881_v33 = vsel %vm831_vm1, %v1534_v30, 0.0 }
 0x173   : > { %890 = vadd.xlane.f32.xlu1 %v889_v31 }
 0x174   : > { %v892_v34 = vsel %vm831_vm1, %v888_v32, 0.0 }
 0x175   : > { %882 = vadd.xlane.f32.xlu0 %v881_v33 }
 0x177   : > { %893 = vadd.xlane.f32.xlu1 %v892_v34 }
 0x1fe   : > { %v880_v35 = vpop.xlane.xlu0 %879 }
 0x1ff   : > { %v885_v36 = vmul.f32 0.03125, %v880_v35 }
 0x200   : > { %v891_v37 = vpop.xlane.xlu1 %890 }
 0x201   : > { %v899_v38 = vmul.f32 %v885_v36, %v885_v36  ;;  %v895_v39 = vmul.f32 0.03125, %v891_v37  ;;  %v897_v49 = vsub.f32 %v1532_v27, %v885_v36 }
 0x202   : > { %v883_v40 = vpop.xlane.xlu0 %882 }
 0x203   : > { %v901_v41 = vsub.f32 %v895_v39, %v899_v38  ;;  %v886_v42 = vmul.f32 0.03125, %v883_v40 }
 0x204   : > { %v894_v43 = vpop.xlane.xlu1 %893 }
 0x205   : > { %v903_v44 = vadd.f32 1e-05, %v901_v41  ;;  %v900_v45 = vmul.f32 %v886_v42, %v886_v42  ;;  %v896_v46 = vmul.f32 0.03125, %v894_v43  ;;  %v898_v53 = vsub.f32 %v1534_v30, %v886_v42 }
 0x207   : > { %1535 = vrsqrt.f32 %v903_v44  ;;  %v902_v47 = vsub.f32 %v896_v46, %v900_v45 }
 0x209   : > { %v904_v48 = vadd.f32 1e-05, %v902_v47 }
 0x20b   : > { %1537 = vrsqrt.f32 %v904_v48 }
 0x211   : > { %v1536_v50 = vpop.eup %1535 }
 0x212   : > { %v907_v51 = vmul.f32 %v1536_v50, %v897_v49 }
 0x214   : > { %v916_v55 = vmul.f32 %v1269_v52, %v907_v51 }
 0x215   : > { %v1538_v54 = vpop.eup %1537 }
 0x216   : > { %v908_v56 = vmul.f32 %v1538_v54, %v898_v53  ;;  %v925_v59 = vadd.f32 %v1270_v57, %v916_v55 }
 0x218   : > { %v917_v58 = vmul.f32 %v1269_v52, %v908_v56 }
 0x21a   : > { %v926_v60 = vadd.f32 %v1270_v57, %v917_v58 }
 0x21c   : > { %v927_v61 = vpack.c.bf16 %v926_v60, %v925_v59 }
 0x21e   : > { %928 = vst.msk [vmem:[#allocation2] sm:$0xff] %vm831_vm1, %v927_v61 }
 0x21f PF: > { %v1539_v62 = vld [vmem:[%s2024_s5 + $0x4] ss:$8 sps:$4 sm:$0xff]   ;;  %v1541_v63 = vld [vmem:[%s2024_s5] ss:$8 sps:$4 sm:$0xff]   ;;  %v1757_v0 = vmov 0   ;;  %vm966_vm2 = vcmask 261120   ;;  %v936_v4 = vlaneseq }
 0x220   : > { %1002 = vmatprep.mubr.bf16.mxu0 %v1757_v0  ;;  %970 = vmatprep.subr.bf16.mxu0 %v1539_v62  ;;  %v1542_v1 = vld [vmem:[%s2024_s5 + $0x14] ss:$8 sps:$4 sm:$0xff]   ;;  %v1544_v2 = vld [vmem:[%s2024_s5 + $0x10] ss:$8 sps:$4 sm:$0xff]   ;;  %s2065_s15 = scalar_lea.sflag [#allocation5], %s763_s11  ;;  %s1027_s9 = ssub.s32 (%p1880_p10), 3, %s2011_s20 }
 0x221   : > { %971 = vmatpush1.bf16.msra.mxu0 %v1541_v63  ;;  %v937_v5 = vshrl.u32 %v936_v4, 7  ;;  %v934_v7 = vld [vmem:[%s784_s23] sm:$0x3]  ;;  %p1028_p6 = scmp.lt.s32.totalorder (%p1880_p10), %s1027_s9, 2 }
 0x222   : > { %972 = vmatprep.subr.bf16.mxu0 %v1542_v1 }
 0x223   : > { %v938_v6 = vsub.s32 0, %v937_v5  ;;  %v942_v8 = vsub.s32 1, %v937_v5 }
 0x225   : > { %973 = vmatpush1.bf16.msra.mxu0 %v1544_v2  ;;  %v929_v3 = vld [vmem:[#allocation2] sm:$0xff]  ;;  %v939_v9 = vrot.slane %v934_v7, %v938_v6  ;;  %v943_v10 = vrot.slane %v934_v7, %v942_v8 }
 0x228   : > { %1275 = vmatmul.mubr.msk.bf16.vlgmr.msra.gmra.mrb[0].mxu0 %vm966_vm2, %v929_v3 }
 0x2fb   : > { %v1004_v11 = vpop.f32.mrb[0].mxu0  ;;  %1024 = sbr.rel (!%p1880_p10) target bundleno = 800 (0x320), region = 122 }
 0x2fc   : > { %v1005_v12 = vadd.f32 %v1004_v11, %v939_v9  ;;  %v1006_v13 = vpop.f32.mrb[1].mxu0 }
 0x2fd   : > { %v1007_v14 = vadd.f32 %v1006_v13, %v943_v10  ;;  %v1008_v15 = vpop.f32.mrb[2].mxu0 }
 0x2fe   : > { %1013 = vst [vmem:[%s2026_s8] sm:$0xff] %v1005_v12  ;;  %v1009_v16 = vadd.f32 %v1008_v15, %v939_v9  ;;  %v1010_v17 = vpop.f32.mrb[3].mxu0 }
 0x2ff   : > { %1014 = vst [vmem:[%s2026_s8 + $0x8] sm:$0xff] %v1007_v14  ;;  %v1011_v18 = vadd.f32 %v1010_v17, %v943_v10 }
 0x300   : > { %1015 = vst [vmem:[%s2026_s8 + $0x10] sm:$0xff] %v1009_v16 }
 0x301   : > { %1016 = vst [vmem:[%s2026_s8 + $0x18] sm:$0xff] %v1011_v18 }
 0x302   : > { %s2211_s9 = smov (!%p1028_p6, %s1027_s9), 2 }
 0x303   : > { %s2073_s23 = sshll.u32 %s2211_s9, 8 }
 0x304   : > { %s1032_s5 = ssub.s32 512, %s2073_s23 }
 0x305   : > { %1033 = vsyncadd %s2065_s15, %s1032_s5  ;;  %p1280_p10 = scmp.ne.s32.totalorder %s2073_s23, 0  ;;  %s1306_s22 = smul.u32 6, %s1707_s30 }
 0x306   : > { %s1283_s11 = sshll.u32 %s2211_s9, 3  ;;  %s1041_s26 = sshll.u32 %s2026_s8, 4  ;;  %s2082_s26 = int_to_ptr.vmem [resolvable:$true] %s1041_s26 }
 0x307   : > { %s1036_s13 = sadd.s32 %s1306_s22, %s2011_s20  ;;  %s1545_s17 = scalar_lea.vmem %s2082_s26, %s2073_s23 }
 0x308   : > { %s1282_s19 = sshll.u32 %s1036_s13, 7  ;;  %p1546_p7 = scmp.ne.s32.totalorder %s2082_s26, %s1545_s17 }
 0x309   : > { %s2087_s14 = scalar_lea.hbm %s2157_s7, %s1282_s19  ;;  %s1758_s30 = smov [#allocation4]  }
 0x30a   : > { %p1547_p8 = pnand %p1546_p7, %p1280_p10  ;;  %s1549_s16 = sshll.u32 %s1758_s30, 4  ;;  %s1550_s16 = int_to_ptr.vmem [resolvable:$false] %s1549_s16 }
 0x30b   : > { %s1551_s20 = scalar_lea.vmem %s1550_s16, 1024  ;;  %p1552_p11 = scmp.lt.s32.totalorder %s2082_s26, %s1550_s16 }
 0x30c   : > { %p1548_p9 = pneg %p1547_p8  ;;  %p1553_p13 = scmp.lt.s32.totalorder %s1551_s20, %s1545_s17 }
 0x30e   : > { %p1554_p0 = por %p1553_p13, %p1552_p11 }
 0x310   : > { %p1555_p1 = pnand %p1554_p0, %p1548_p9 }
 0x312   : > { %1558 = shalt.err (!%p1555_p1)
}
 0x313   : > { %s1559_s8 = scalar_lea.hbm %s2087_s14, %s2073_s23  ;;  %s1563_s27 = scalar_lea.hbm %s2157_s7, 1536 }
 0x314   : > { %p1560_p2 = scmp.ne.s32.totalorder %s2087_s14, %s1559_s8  ;;  %p1564_p5 = scmp.lt.u32.totalorder %s2087_s14, %s2157_s7 }
 0x315   : > { %p1565_p6 = scmp.lt.u32.totalorder %s1563_s27, %s1559_s8  ;;  %p1567_p8 = scmp.lt.u32.totalorder %s1559_s8, %s2087_s14 }
 0x316   : > { %p1561_p3 = pnand %p1560_p2, %p1280_p10 }
 0x317   : > { %p1566_p7 = por %p1565_p6, %p1564_p5 }
 0x318   : > { %p1562_p4 = pneg %p1561_p3 }
 0x319   : > { %p1568_p9 = por %p1567_p8, %p1566_p7 }
 0x31b   : > { %p1569_p11 = pnand %p1568_p9, %p1562_p4 }
 0x31d   : > { %1572 = shalt.err (!%p1569_p11)
}
 0x31e   : > { %s1759_s22 = smov 256   ;;  %s1760_s13 = smov 384  }
 0x31f   : > { %1047 = dma.vmem_to_hbm [thread:$0]  (%p1280_p10), %s2082_s26, %s2073_s23, %s2087_s14, %s2065_s15, %s1759_s22, %s1760_s13, %s1283_s11  }
 0x320 PF: > { %p1312_p13 = scmp.ge.s32.totalorder %s1719_s10, 2  ;;  %s1056_s12 = sand.u32 1, %s1683_s24  }
 0x321   : > { %s1057_s29 = scalar_lea.sflag [#allocation5], %s1056_s12 }
 0x322   : > { %p1309_p0 = pnand %p1312_p13, %p1887_p12 }
 0x324   : > { %1678 = dma.done.wait (!%p1309_p0), %s1057_s29, 512  }
 0x325   : > { %1680 = vsyncadd (!%p1309_p0), %s1057_s29, 4294966784  ;;  %s20_s10 = sadd.s32 1, %s1719_s10   ;;  %s2186_s17 = sld [smem:[#allocation7_spill]] }
 0x326   : > { %p17_p1 = scmp.ge.s32.totalorder %s20_s10, 6   ;;  %s2187_s26 = sld [smem:[#allocation14_spill]] }
 0x327   : > { %s2188_s27 = sld [smem:[#allocation8_spill]]  ;;  %s2189_s28 = sld [smem:[#allocation13_spill]] }
 0x328   : > { %s2190_s29 = sld [smem:[#allocation9_spill]]  ;;  %s2191_s30 = sld [smem:[#allocation10_spill]] }
 0x329   : > { %s2192_s8 = sld [smem:[#allocation11_spill]]  ;;  %s2193_s9 = sld [smem:[#allocation12_spill]] }
 0x32a   : > { %s2194_s24 = smov %s1687_s25  ;;  %19 = sbr.rel (!%p17_p1) target bundleno = 8 (0x8), region = 226 }
 0x32b   : > { %s2195_s25 = smov %s2186_s17 }
 0x331   :  { %1062 = vsyncpa [#allocation5], 1 }
 0x332   :  { %1064 = vsyncpa [#allocation5 + $0x1], 1 }

</bundles_post_ra>
